<compile_context>
chip_gen: v6e
topology: v6e:2x2x1
jax: 0.10.0
libtpu: 0.0.40
codegen_flags: <defaults>
</compile_context>

<pallas_src>
import functools

import jax
import jax.numpy as jnp
from jax.experimental import pallas as pl
from jax.experimental.pallas import tpu as pltpu

HIDDEN_DIM = 64
LANE = 128        # lane width: feature dims are zero-padded to a multiple of this
MAX_TILE_B = 128  # batch rows per grid step


def _round_up(n, m):
    return (n + m - 1) // m * m


# ----------------------------- Pallas kernel --------------------------------
def _mlp_kernel(num_districts,
                states_ref, sel_ref, slot_ref,
                w1_ref, b1_ref, w2_ref, b2_ref, w3_ref, b3_ref,
                o_ref):
    # Fused one-hot encoding (no gathers / reshapes):
    #   s_rep[b, j] = state[b, j // (D+1)]   via a 0/1 selection matmul
    #   x[b, j]     = 1.0 iff s_rep[b, j] == (j % (D+1)); 0 on padded columns
    s = states_ref[...]                                     # (TB, NN) int32
    s = jnp.where(s < 0, num_districts, s)                  # -1 -> last slot
    s_rep = jnp.dot(s.astype(jnp.float32), sel_ref[...],
                    preferred_element_type=jnp.float32)     # (TB, D_in_pad)
    x = (jnp.abs(s_rep - slot_ref[...]) < 0.5).astype(jnp.float32)

    # 3-layer MLP on lane-dense (128-wide) zero-padded features; f32 MXU acc.
    h1 = jnp.dot(x, w1_ref[...], preferred_element_type=jnp.float32) + b1_ref[...]
    h1 = jnp.maximum(h1, 0.0)
    h2 = jnp.dot(h1, w2_ref[...], preferred_element_type=jnp.float32) + b2_ref[...]
    h2 = jnp.maximum(h2, 0.0)
    o_ref[...] = (
        jnp.dot(h2, w3_ref[...], preferred_element_type=jnp.float32) + b3_ref[...]
    )


# --------------------- parameter padding + one-hot helpers -------------------
def prepare_params(params, num_nodes, num_districts):
    """Zero-pad weights/biases to 128-lane shapes and build one-hot constants."""
    d_in = num_nodes * (num_districts + 1)
    d_out = num_nodes * num_districts
    d_in_p = _round_up(d_in, LANE)
    h_p = _round_up(HIDDEN_DIM, LANE)
    d_out_p = _round_up(d_out, LANE)

    def pad2(a, rows, cols):
        return jnp.pad(a, ((0, rows - a.shape[0]), (0, cols - a.shape[1])))

    col = jnp.arange(d_in_p)
    node = col // (num_districts + 1)
    slot = col % (num_districts + 1)
    real = col < d_in
    # sel[n, j] = 1 where column j belongs to node n's one-hot block.
    sel = ((node[None, :] == jnp.arange(num_nodes)[:, None]) & real[None, :])
    col_slot = jnp.where(real, slot, -1).astype(jnp.float32)[None, :]  # (1, D_in_pad)

    return {
        "sel": sel.astype(jnp.float32),
        "col_slot": col_slot,
        "w1": pad2(params["w1"], d_in_p, h_p), "b1": pad2(params["b1"], 1, h_p),
        "w2": pad2(params["w2"], h_p, h_p),    "b2": pad2(params["b2"], 1, h_p),
        "w3": pad2(params["w3"], h_p, d_out_p), "b3": pad2(params["b3"], 1, d_out_p),
    }


# ------------------------------ forward wrappers -----------------------------
@functools.partial(jax.jit, static_argnames=("num_nodes", "num_districts"))
def gflownet_policy_forward_batched(states, prepped, num_nodes, num_districts):
    """states: (B, num_nodes) int32  ->  logits: (B, num_nodes*num_districts) f32."""
    b = states.shape[0]
    d_out = num_nodes * num_districts
    d_out_p = prepped["w3"].shape[1]

    tile_b = min(MAX_TILE_B, _round_up(b, 8))      # rows per grid step (multiple of 8)
    b_pad = _round_up(b, tile_b)
    states_p = jnp.pad(states.astype(jnp.int32), ((0, b_pad - b), (0, 0)))

    def const_spec(shape):
        # Same block every grid step -> stays VMEM-resident (no re-DMA).
        return pl.BlockSpec(shape, lambda i: (0, 0))

    out = pl.pallas_call(
        functools.partial(_mlp_kernel, num_districts),
        out_shape=jax.ShapeDtypeStruct((b_pad, d_out_p), jnp.float32),
        grid=(b_pad // tile_b,),
        in_specs=[
            pl.BlockSpec((tile_b, num_nodes), lambda i: (i, 0)),   # states tile
            const_spec(prepped["sel"].shape),
            const_spec(prepped["col_slot"].shape),
            const_spec(prepped["w1"].shape), const_spec(prepped["b1"].shape),
            const_spec(prepped["w2"].shape), const_spec(prepped["b2"].shape),
            const_spec(prepped["w3"].shape), const_spec(prepped["b3"].shape),
        ],
        out_specs=pl.BlockSpec((tile_b, d_out_p), lambda i: (i, 0)),
        compiler_params=pltpu.CompilerParams(dimension_semantics=("parallel",)),
    )(states_p, prepped["sel"], prepped["col_slot"],
      prepped["w1"], prepped["b1"], prepped["w2"], prepped["b2"],
      prepped["w3"], prepped["b3"])

    return out[:b, :d_out]


def gflownet_policy_forward(state, prepped, num_nodes, num_districts):
    """Matches the PyTorch module: state (num_nodes,) -> logits (num_nodes*num_districts,)."""
    return gflownet_policy_forward_batched(
        state[None, :], prepped, num_nodes, num_districts)[0]


# ----------------------- deterministic parameter init ------------------------
def init_params(key, num_nodes, num_districts):
    input_dim = num_nodes * (num_districts + 1)
    out_dim = num_nodes * num_districts

    def linear(k, fan_in, fan_out):
        # PyTorch nn.Linear default: U(-1/sqrt(fan_in), 1/sqrt(fan_in)).
        kw, kb = jax.random.split(k)
        bound = 1.0 / jnp.sqrt(jnp.float32(fan_in))
        w = jax.random.uniform(kw, (fan_in, fan_out), jnp.float32, -bound, bound)
        b = jax.random.uniform(kb, (1, fan_out), jnp.float32, -bound, bound)
        return w, b

    k1, k2, k3 = jax.random.split(key, 3)
    w1, b1 = linear(k1, input_dim, HIDDEN_DIM)
    w2, b2 = linear(k2, HIDDEN_DIM, HIDDEN_DIM)
    w3, b3 = linear(k3, HIDDEN_DIM, out_dim)
    return {"w1": w1, "b1": b1, "w2": w2, "b2": b2, "w3": w3, "b3": b3}


# ------------------------------ pure-JAX reference ---------------------------
def reference_forward(states, params, num_nodes, num_districts):
    idx = jnp.where(states < 0, num_districts, states)
    x = jax.nn.one_hot(idx, num_districts + 1, dtype=jnp.float32).reshape(
        states.shape[0], -1)
    hp = jax.lax.Precision.HIGHEST
    h1 = jax.nn.relu(jnp.dot(x, params["w1"], precision=hp) + params["b1"])
    h2 = jax.nn.relu(jnp.dot(h1, params["w2"], precision=hp) + params["b2"])
    return jnp.dot(h2, params["w3"], precision=hp) + params["b3"]


# ---------------------------------- main -------------------------------------
if __name__ == "__main__":
    num_nodes = 8
    num_districts = 4
    batch = 256

    key = jax.random.PRNGKey(0)
    pkey, skey = jax.random.split(key)
    params = init_params(pkey, num_nodes, num_districts)
    prepped = prepare_params(params, num_nodes, num_districts)

    # Deterministic example states: ints in {-1, 0..num_districts-1}.
    states = jax.random.randint(
        skey, (batch, num_nodes), -1, num_districts, dtype=jnp.int32)

    # Batched kernel run.
    logits = gflownet_policy_forward_batched(states, prepped, num_nodes, num_districts)
    logits = jax.block_until_ready(logits)
    assert logits.shape == (batch, num_nodes * num_districts)
    assert logits.dtype == jnp.float32

    # Numerical check vs plain-JAX reference of the PyTorch forward.
    ref = reference_forward(states, params, num_nodes, num_districts)
    max_err = float(jnp.max(jnp.abs(logits - ref)))
    assert jnp.allclose(logits, ref, atol=1e-4, rtol=1e-4), max_err

    # Single-state path matching the original module's signature.
    single = gflownet_policy_forward(states[0], prepped, num_nodes, num_districts)
    single = jax.block_until_ready(single)
    assert single.shape == (num_nodes * num_districts,)
    assert jnp.allclose(single, ref[0], atol=1e-4, rtol=1e-4)

    print("KERNEL_OK")
</pallas_src>

<mosaic_0001>
module attributes {stable_mosaic.version = 11 : i64} {
  func.func @_mlp_kernel(%arg0: i32, %arg1: memref<128x8xi32, #tpu.memory_space<vmem>>, %arg2: memref<8x128xf32, #tpu.memory_space<vmem>>, %arg3: memref<1x128xf32, #tpu.memory_space<vmem>>, %arg4: memref<128x128xf32, #tpu.memory_space<vmem>>, %arg5: memref<1x128xf32, #tpu.memory_space<vmem>>, %arg6: memref<128x128xf32, #tpu.memory_space<vmem>>, %arg7: memref<1x128xf32, #tpu.memory_space<vmem>>, %arg8: memref<128x128xf32, #tpu.memory_space<vmem>>, %arg9: memref<1x128xf32, #tpu.memory_space<vmem>>, %arg10: memref<128x128xf32, #tpu.memory_space<vmem>>) attributes {dimension_semantics = [#tpu.dimension_semantics<parallel>], iteration_bounds = array<i64: 2>, scalar_prefetch = 0 : i64, scratch_operands = 0 : i64, tpu.core_type = #tpu.core_type<tc>, window_params = [{transform_indices = @transform_0, window_bounds = array<i64: 128, 8>}, {pipeline_mode = #tpu.pipeline_mode<synchronous>, transform_indices = @transform_1, window_bounds = array<i64: 8, 128>}, {pipeline_mode = #tpu.pipeline_mode<synchronous>, transform_indices = @transform_2, window_bounds = array<i64: 1, 128>}, {pipeline_mode = #tpu.pipeline_mode<synchronous>, transform_indices = @transform_3, window_bounds = array<i64: 128, 128>}, {pipeline_mode = #tpu.pipeline_mode<synchronous>, transform_indices = @transform_4, window_bounds = array<i64: 1, 128>}, {pipeline_mode = #tpu.pipeline_mode<synchronous>, transform_indices = @transform_5, window_bounds = array<i64: 128, 128>}, {pipeline_mode = #tpu.pipeline_mode<synchronous>, transform_indices = @transform_6, window_bounds = array<i64: 1, 128>}, {pipeline_mode = #tpu.pipeline_mode<synchronous>, transform_indices = @transform_7, window_bounds = array<i64: 128, 128>}, {pipeline_mode = #tpu.pipeline_mode<synchronous>, transform_indices = @transform_8, window_bounds = array<i64: 1, 128>}, {transform_indices = @transform_9, window_bounds = array<i64: 128, 128>}]} {
    %c0 = arith.constant 0 : index
    %c0_0 = arith.constant 0 : index
    %0 = vector.load %arg1[%c0, %c0_0] : memref<128x8xi32, #tpu.memory_space<vmem>>, vector<128x8xi32>
    %c0_i32 = arith.constant 0 : i32
    %1 = vector.broadcast %c0_i32 : i32 to vector<128x8xi32>
    %2 = arith.cmpi slt, %0, %1 : vector<128x8xi32>
    %c4_i32 = arith.constant 4 : i32
    %3 = vector.broadcast %c4_i32 : i32 to vector<128x8xi32>
    %4 = arith.select %2, %3, %0 : vector<128x8xi1>, vector<128x8xi32>
    %5 = arith.sitofp %4 : vector<128x8xi32> to vector<128x8xf32>
    %c0_1 = arith.constant 0 : index
    %c0_2 = arith.constant 0 : index
    %6 = vector.load %arg2[%c0_1, %c0_2] : memref<8x128xf32, #tpu.memory_space<vmem>>, vector<8x128xf32>
    %cst = arith.constant dense<0.000000e+00> : vector<128x128xf32>
    %7 = tpu.matmul %5, %6, %cst {dimension_numbers = #tpu.dot_dimension_numbers<[1], [0], [0], [1], [0, 0, 1, 1], [], []>} : vector<128x8xf32>, vector<8x128xf32>, vector<128x128xf32> -> vector<128x128xf32>
    %c0_3 = arith.constant 0 : index
    %c0_4 = arith.constant 0 : index
    %8 = vector.load %arg3[%c0_3, %c0_4] : memref<1x128xf32, #tpu.memory_space<vmem>>, vector<1x128xf32>
    %9 = vector.broadcast %8 : vector<1x128xf32> to vector<128x128xf32>
    %10 = arith.subf %7, %9 : vector<128x128xf32>
    %11 = math.absf %10 : vector<128x128xf32>
    %cst_5 = arith.constant 5.000000e-01 : f32
    %12 = vector.broadcast %cst_5 : f32 to vector<128x128xf32>
    %13 = arith.cmpf olt, %11, %12 : vector<128x128xf32>
    %14 = arith.extui %13 : vector<128x128xi1> to vector<128x128xi32>
    %15 = arith.sitofp %14 : vector<128x128xi32> to vector<128x128xf32>
    %c0_6 = arith.constant 0 : index
    %c0_7 = arith.constant 0 : index
    %16 = vector.load %arg4[%c0_6, %c0_7] : memref<128x128xf32, #tpu.memory_space<vmem>>, vector<128x128xf32>
    %cst_8 = arith.constant dense<0.000000e+00> : vector<128x128xf32>
    %17 = tpu.matmul %15, %16, %cst_8 {dimension_numbers = #tpu.dot_dimension_numbers<[1], [0], [0], [1], [0, 0, 1, 1], [], []>} : vector<128x128xf32>, vector<128x128xf32>, vector<128x128xf32> -> vector<128x128xf32>
    %c0_9 = arith.constant 0 : index
    %c0_10 = arith.constant 0 : index
    %18 = vector.load %arg5[%c0_9, %c0_10] : memref<1x128xf32, #tpu.memory_space<vmem>>, vector<1x128xf32>
    %19 = vector.broadcast %18 : vector<1x128xf32> to vector<128x128xf32>
    %20 = arith.addf %17, %19 : vector<128x128xf32>
    %cst_11 = arith.constant 0.000000e+00 : f32
    %21 = vector.broadcast %cst_11 : f32 to vector<128x128xf32>
    %22 = arith.maximumf %20, %21 : vector<128x128xf32>
    %c0_12 = arith.constant 0 : index
    %c0_13 = arith.constant 0 : index
    %23 = vector.load %arg6[%c0_12, %c0_13] : memref<128x128xf32, #tpu.memory_space<vmem>>, vector<128x128xf32>
    %cst_14 = arith.constant dense<0.000000e+00> : vector<128x128xf32>
    %24 = tpu.matmul %22, %23, %cst_14 {dimension_numbers = #tpu.dot_dimension_numbers<[1], [0], [0], [1], [0, 0, 1, 1], [], []>} : vector<128x128xf32>, vector<128x128xf32>, vector<128x128xf32> -> vector<128x128xf32>
    %c0_15 = arith.constant 0 : index
    %c0_16 = arith.constant 0 : index
    %25 = vector.load %arg7[%c0_15, %c0_16] : memref<1x128xf32, #tpu.memory_space<vmem>>, vector<1x128xf32>
    %26 = vector.broadcast %25 : vector<1x128xf32> to vector<128x128xf32>
    %27 = arith.addf %24, %26 : vector<128x128xf32>
    %cst_17 = arith.constant 0.000000e+00 : f32
    %28 = vector.broadcast %cst_17 : f32 to vector<128x128xf32>
    %29 = arith.maximumf %27, %28 : vector<128x128xf32>
    %c0_18 = arith.constant 0 : index
    %c0_19 = arith.constant 0 : index
    %30 = vector.load %arg8[%c0_18, %c0_19] : memref<128x128xf32, #tpu.memory_space<vmem>>, vector<128x128xf32>
    %cst_20 = arith.constant dense<0.000000e+00> : vector<128x128xf32>
    %31 = tpu.matmul %29, %30, %cst_20 {dimension_numbers = #tpu.dot_dimension_numbers<[1], [0], [0], [1], [0, 0, 1, 1], [], []>} : vector<128x128xf32>, vector<128x128xf32>, vector<128x128xf32> -> vector<128x128xf32>
    %c0_21 = arith.constant 0 : index
    %c0_22 = arith.constant 0 : index
    %32 = vector.load %arg9[%c0_21, %c0_22] : memref<1x128xf32, #tpu.memory_space<vmem>>, vector<1x128xf32>
    %33 = vector.broadcast %32 : vector<1x128xf32> to vector<128x128xf32>
    %34 = arith.addf %31, %33 : vector<128x128xf32>
    %c0_23 = arith.constant 0 : index
    %c0_24 = arith.constant 0 : index
    %35 = vector.load %arg10[%c0_23, %c0_24] : memref<128x128xf32, #tpu.memory_space<vmem>>, vector<128x128xf32>
    tpu.vector_store %arg10[%c0_23, %c0_24], %34 {strides = array<i32>} : memref<128x128xf32, #tpu.memory_space<vmem>>, vector<128x128xf32>,
    return
  }
  func.func @transform_0(%arg0: i32) -> (i32, i32) {
    %c0_i32 = arith.constant 0 : i32
    %c0_i32_0 = arith.constant 0 : i32
    return %arg0, %c0_i32 : i32, i32
  }
  func.func @transform_1(%arg0: i32) -> (i32, i32) {
    %c0_i32 = arith.constant 0 : i32
    %c0_i32_0 = arith.constant 0 : i32
    %c0_i32_1 = arith.constant 0 : i32
    return %c0_i32, %c0_i32_0 : i32, i32
  }
  func.func @transform_2(%arg0: i32) -> (i32, i32) {
    %c0_i32 = arith.constant 0 : i32
    %c0_i32_0 = arith.constant 0 : i32
    %c0_i32_1 = arith.constant 0 : i32
    return %c0_i32, %c0_i32_0 : i32, i32
  }
  func.func @transform_3(%arg0: i32) -> (i32, i32) {
    %c0_i32 = arith.constant 0 : i32
    %c0_i32_0 = arith.constant 0 : i32
    %c0_i32_1 = arith.constant 0 : i32
    return %c0_i32, %c0_i32_0 : i32, i32
  }
  func.func @transform_4(%arg0: i32) -> (i32, i32) {
    %c0_i32 = arith.constant 0 : i32
    %c0_i32_0 = arith.constant 0 : i32
    %c0_i32_1 = arith.constant 0 : i32
    return %c0_i32, %c0_i32_0 : i32, i32
  }
  func.func @transform_5(%arg0: i32) -> (i32, i32) {
    %c0_i32 = arith.constant 0 : i32
    %c0_i32_0 = arith.constant 0 : i32
    %c0_i32_1 = arith.constant 0 : i32
    return %c0_i32, %c0_i32_0 : i32, i32
  }
  func.func @transform_6(%arg0: i32) -> (i32, i32) {
    %c0_i32 = arith.constant 0 : i32
    %c0_i32_0 = arith.constant 0 : i32
    %c0_i32_1 = arith.constant 0 : i32
    return %c0_i32, %c0_i32_0 : i32, i32
  }
  func.func @transform_7(%arg0: i32) -> (i32, i32) {
    %c0_i32 = arith.constant 0 : i32
    %c0_i32_0 = arith.constant 0 : i32
    %c0_i32_1 = arith.constant 0 : i32
    return %c0_i32, %c0_i32_0 : i32, i32
  }
  func.func @transform_8(%arg0: i32) -> (i32, i32) {
    %c0_i32 = arith.constant 0 : i32
    %c0_i32_0 = arith.constant 0 : i32
    %c0_i32_1 = arith.constant 0 : i32
    return %c0_i32, %c0_i32_0 : i32, i32
  }
  func.func @transform_9(%arg0: i32) -> (i32, i32) {
    %c0_i32 = arith.constant 0 : i32
    %c0_i32_0 = arith.constant 0 : i32
    return %arg0, %c0_i32 : i32, i32
  }
}

</mosaic_0001>

<bundles_post_ra>
// kernel: gflownet_policy_forward_batched.1
= control target key start
LH: loop header
LB: loop body
LE: loop exit
PB: predicated region body
PF: predicated region fallthrough
CT: control target
= control target key end

     0   :  { %14 = vsyncpa [#allocation3], 0  ;;  %s1835_s30 = smov 0   ;;  %s2143_s0 = inlined_call_operand.vmem [shape: s32[256,8], index: 0, kind: input, shape index: {}]   ;;  %s2144_s1 = inlined_call_operand.vmem [shape: f32[8,128], index: 1, kind: input, shape index: {}]   ;;  %s2145_s2 = inlined_call_operand.vmem [shape: f32[1,128], index: 2, kind: input, shape index: {}]   ;;  %s2146_s3 = inlined_call_operand.vmem [shape: f32[128,128], index: 3, kind: input, shape index: {}]   ;;  %s2147_s4 = inlined_call_operand.vmem [shape: f32[1,128], index: 4, kind: input, shape index: {}]   ;;  %s2148_s5 = inlined_call_operand.vmem [shape: f32[128,128], index: 5, kind: input, shape index: {}]   ;;  %s2149_s6 = inlined_call_operand.vmem [shape: f32[1,128], index: 6, kind: input, shape index: {}]   ;;  %s2150_s7 = inlined_call_operand.hbm [shape: f32[128,128], index: 7, kind: input, shape index: {}]   ;;  %s2151_s8 = inlined_call_operand.vmem [shape: f32[1,128], index: 8, kind: input, shape index: {}]   ;;  %s2152_s9 = inlined_call_operand.vmem [shape: f32[256,128], index: 9, kind: output, shape index: {}]  }
   0x1 LB: > { %s1317_s10 = sadd.s32 4294967295, %s1779_s30   ;;  %p1319_p0 = scmp.ge.s32.totalorder %s1779_s30, 1  ;;  %s1779_s30 = sphi %s1835_s30, %s20_s30  }
   0x2   : > { %p245_p1 = scmp.lt.s32.totalorder %s1779_s30, 3  ;;  %s1781_s11 = smov [#allocation2]  }
   0x3   : > { %s275_s12 = sshll.u32 %s1781_s11, 4  ;;  %p1847_p3 = scmp.eq.s32.totalorder %s1317_s10, 0  ;;  %s276_s12 = int_to_ptr.vmem [resolvable:$true] %s275_s12 }
   0x4   : > { %p1843_p2 = pnand %p1319_p0, %p245_p1  ;;  %s1754_s15 = scalar_lea.vmem %s276_s12, 2048 }
   0x5   : > { %p1755_p7 = scmp.ne.s32.totalorder %s276_s12, %s1754_s15  ;;  %p1762_p10 = scmp.lt.s32.totalorder %s276_s12, %s276_s12 }
   0x6   : > { %p1725_p4 = pneg %p1843_p2  ;;  %p1763_p11 = scmp.lt.s32.totalorder %s1754_s15, %s1754_s15 }
   0x8   : > { %p1726_p5 = pnand %p1847_p3, %p1725_p4  ;;  %p1764_p12 = por %p1763_p11, %p1762_p10 }
   0xa   : > { %p1745_p6 = pneg %p1726_p5 }
   0xc   : > { %p1757_p8 = pnand %p1755_p7, %p1745_p6 }
   0xe   : > { %p1758_p9 = pneg %p1757_p8 }
  0x10   : > { %p1765_p13 = pnand %p1764_p12, %p1758_p9 }
  0x12   : > { %1768 = shalt.err (!%p1765_p13)
}
  0x13   : > { %s1782_s16 = smov 128   ;;  %s1783_s17 = smov 8  }
  0x14   : > { %1728 = dma.hbm_to_vmem [thread:$0]  (!%p1726_p5), %s2150_s7, 2048, %s276_s12, [#allocation3], %s1782_s16, %s1782_s16, %s1783_s17  }
  0x15   : > { %303 = sbr.rel (%p1843_p2) target bundleno = 866 (0x362), region = 56 }
  0x1a   : > { %1774 = dma.done.wait (%p1847_p3), [#allocation3], 2048  }
  0x1b   : > { %1776 = vsyncadd (%p1847_p3), [#allocation3], 4294965248  ;;  %s1324_s20 = sshll.u32 %s1317_s10, 4  ;;  %v415_v0 = vld [vmem:[%s2144_s1] sm:$0xff]  ;;  %vm416_vm1 = vcmask 64512   ;;  %v712_v19 = vld [vmem:[%s2146_s3 + $0x78] sm:$0xff] }
  0x1c   : > { %p340_p0 = scmp.lt.s32.totalorder %s1324_s20, 31  ;;  %1495 = vmatprep.subr.mxu0 %v415_v0  ;;  %v711_v20 = vld [vmem:[%s2146_s3 + $0x70] sm:$0xff]  ;;  %1521 = vmatprep.subr.mxu1 %v712_v19  ;;  %v710_v24 = vld [vmem:[%s2146_s3 + $0x68] sm:$0xff]  ;;  %v709_v28 = vld [vmem:[%s2146_s3 + $0x60] sm:$0xff] }
  0x1d   : > { %1496 = vmatpush3.msra.mxu0 %v415_v0  ;;  %1522 = vmatpush3.msra.mxu1 %v712_v19  ;;  %v708_v32 = vld [vmem:[%s2146_s3 + $0x58] sm:$0xff]  ;;  %v707_v36 = vld [vmem:[%s2146_s3 + $0x50] sm:$0xff]  ;;  %v706_v40 = vld [vmem:[%s2146_s3 + $0x48] sm:$0xff] }
  0x1e   : > { %s2156_s20 = smov (!%p340_p0, %s1324_s20), 31  ;;  %1523 = vmatprep.subr.mxu1 %v711_v20  ;;  %v705_v44 = vld [vmem:[%s2146_s3 + $0x40] sm:$0xff]  ;;  %v704_v48 = vld [vmem:[%s2146_s3 + $0x38] sm:$0xff]  ;;  %v703_v51 = vld [vmem:[%s2146_s3 + $0x30] sm:$0xff] }
  0x1f   : > { %s1325_s21 = sshll.u32 %s2156_s20, 3  ;;  %1524 = vmatpush3.msra.mxu1 %v711_v20  ;;  %v702_v55 = vld [vmem:[%s2146_s3 + $0x28] sm:$0xff]  ;;  %v701_v57 = vld [vmem:[%s2146_s3 + $0x20] sm:$0xff]  ;;  %v700_v61 = vld [vmem:[%s2146_s3 + $0x18] sm:$0xff] }
  0x20   : > { %s1872_s24 = scalar_lea.vmem %s2143_s0, %s1325_s21  ;;  %1525 = vmatprep.subr.mxu1 %v710_v24  ;;  %v699_v62 = vld [vmem:[%s2146_s3 + $0x10] sm:$0xff]  ;;  %v698_v63 = vld [vmem:[%s2146_s3 + $0x8] sm:$0xff]  ;;  %v697_v0 = vld [vmem:[%s2146_s3] sm:$0xff]  ;;  %s2122_s10 = scalar_lea.vmem %s2152_s9, %s1325_s21 }
  0x21   : > { %v351_v1 = vld [vmem:[%s1872_s24] sm:$0xff]  ;;  %v352_v2 = vld [vmem:[%s1872_s24 + $0x8] sm:$0xff]  ;;  %v353_v3 = vld [vmem:[%s1872_s24 + $0x10] sm:$0xff]  ;;  %1526 = vmatpush3.msra.mxu1 %v710_v24 }
  0x22   : > { %vm367_vm0 = vcmp.lt.s32.totalorder %v351_v1, 0  ;;  %vm368_vm2 = vcmp.lt.s32.totalorder %v352_v2, 0  ;;  %v354_v4 = vld [vmem:[%s1872_s24 + $0x18] sm:$0xff]  ;;  %v355_v5 = vld [vmem:[%s1872_s24 + $0x20] sm:$0xff]  ;;  %vm369_vm3 = vcmp.lt.s32.totalorder %v353_v3, 0  ;;  %v356_v8 = vld [vmem:[%s1872_s24 + $0x28] sm:$0xff]  ;;  %1527 = vmatprep.subr.mxu1 %v709_v28 }
  0x23   : > { %v383_v6 = vsel %vm367_vm0, 4, %v351_v1  ;;  %v384_v7 = vsel %vm368_vm2, 4, %v352_v2  ;;  %vm370_vm4 = vcmp.lt.s32.totalorder %v354_v4, 0  ;;  %v357_v9 = vld [vmem:[%s1872_s24 + $0x30] sm:$0xff]  ;;  %v385_v12 = vsel %vm369_vm3, 4, %v353_v3  ;;  %v358_v16 = vld [vmem:[%s1872_s24 + $0x38] sm:$0xff]  ;;  %1528 = vmatpush3.msra.mxu1 %v709_v28 }
  0x24   : > { %v399_v10 = vcvt.s32.f32 %v383_v6  ;;  %v400_v11 = vcvt.s32.f32 %v384_v7  ;;  %v386_v13 = vsel %vm370_vm4, 4, %v354_v4  ;;  %v401_v14 = vcvt.s32.f32 %v385_v12  ;;  %v359_v18 = vld [vmem:[%s1872_s24 + $0x40] sm:$0xff]  ;;  %v360_v25 = vld [vmem:[%s1872_s24 + $0x48] sm:$0xff]  ;;  %v361_v27 = vld [vmem:[%s1872_s24 + $0x50] sm:$0xff]  ;;  %1529 = vmatprep.subr.mxu1 %v708_v32 }
  0x25   : > { %vm371_vm5 = vcmp.lt.s32.totalorder %v355_v5, 0  ;;  %vm372_vm6 = vcmp.lt.s32.totalorder %v356_v8, 0  ;;  %vm373_vm7 = vcmp.lt.s32.totalorder %v357_v9, 0  ;;  %v402_v17 = vcvt.s32.f32 %v386_v13  ;;  %v362_v33 = vld [vmem:[%s1872_s24 + $0x58] sm:$0xff]  ;;  %v363_v35 = vld [vmem:[%s1872_s24 + $0x60] sm:$0xff]  ;;  %1530 = vmatpush3.msra.mxu1 %v708_v32  ;;  %v364_v41 = vld [vmem:[%s1872_s24 + $0x68] sm:$0xff] }
  0x26   : > { %1497 = vmatprep.mubr.msk.f32.mxu0 %vm416_vm1, %v399_v10  ;;  %v387_v15 = vsel %vm371_vm5, 4, %v355_v5  ;;  %v388_v22 = vsel %vm372_vm6, 4, %v356_v8  ;;  %v389_v23 = vsel %vm373_vm7, 4, %v357_v9  ;;  %vm374_vm8 = vcmp.lt.s32.totalorder %v358_v16, 0  ;;  %1531 = vmatprep.subr.mxu1 %v707_v36  ;;  %v365_v43 = vld [vmem:[%s1872_s24 + $0x70] sm:$0xff]  ;;  %v366_v49 = vld [vmem:[%s1872_s24 + $0x78] sm:$0xff] }
  0x27   : > { %1498 = vmatmul.mubr.msk.f32.vlgmr.msra.gmra.mxu0 %vm416_vm1, %v400_v11  ;;  %v403_v21 = vcvt.s32.f32 %v387_v15  ;;  %vm375_vm9 = vcmp.lt.s32.totalorder %v359_v18, 0  ;;  %v404_v26 = vcvt.s32.f32 %v388_v22  ;;  %v405_v29 = vcvt.s32.f32 %v389_v23  ;;  %1532 = vmatpush3.msra.mxu1 %v707_v36  ;;  %v896_v1 = vld [vmem:[%s2148_s5 + $0x78] sm:$0xff]  ;;  %v895_v2 = vld [vmem:[%s2148_s5 + $0x70] sm:$0xff]  ;;  %v894_v3 = vld [vmem:[%s2148_s5 + $0x68] sm:$0xff] }
  0x28   : > { %1500 = vmatprep.mubr.msk.f32.mxu0 %vm416_vm1, %v401_v14  ;;  %v390_v30 = vsel %vm374_vm8, 4, %v358_v16  ;;  %v391_v31 = vsel %vm375_vm9, 4, %v359_v18  ;;  %vm376_vm10 = vcmp.lt.s32.totalorder %v360_v25, 0  ;;  %vm377_vm11 = vcmp.lt.s32.totalorder %v361_v27, 0  ;;  %1533 = vmatprep.subr.mxu1 %v706_v40  ;;  %v893_v4 = vld [vmem:[%s2148_s5 + $0x60] sm:$0xff]  ;;  %v892_v5 = vld [vmem:[%s2148_s5 + $0x58] sm:$0xff] }
  0x29   : > { %v406_v34 = vcvt.s32.f32 %v390_v30  ;;  %v407_v37 = vcvt.s32.f32 %v391_v31  ;;  %v392_v38 = vsel %vm376_vm10, 4, %v360_v25  ;;  %v393_v39 = vsel %vm377_vm11, 4, %v361_v27  ;;  %1534 = vmatpush3.msra.mxu1 %v706_v40  ;;  %1577 = vmatprep.subr.mxu0 %v896_v1  ;;  %v891_v6 = vld [vmem:[%s2148_s5 + $0x50] sm:$0xff]  ;;  %v890_v7 = vld [vmem:[%s2148_s5 + $0x48] sm:$0xff]  ;;  %v889_v8 = vld [vmem:[%s2148_s5 + $0x40] sm:$0xff] }
  0x2a   : > { %vm378_vm12 = vcmp.lt.s32.totalorder %v362_v33, 0  ;;  %vm379_vm13 = vcmp.lt.s32.totalorder %v363_v35, 0  ;;  %v408_v42 = vcvt.s32.f32 %v392_v38  ;;  %v409_v45 = vcvt.s32.f32 %v393_v39  ;;  %1535 = vmatprep.subr.mxu1 %v705_v44  ;;  %1578 = vmatpush3.msra.mxu0 %v896_v1  ;;  %v888_v9 = vld [vmem:[%s2148_s5 + $0x38] sm:$0xff]  ;;  %v887_v10 = vld [vmem:[%s2148_s5 + $0x30] sm:$0xff]  ;;  %v886_v11 = vld [vmem:[%s2148_s5 + $0x28] sm:$0xff] }
  0x2b   : > { %1501 = vmatmul.mubr.msk.f32.gmra.mxu0 %vm416_vm1, %v402_v17  ;;  %v394_v46 = vsel %vm378_vm12, 4, %v362_v33  ;;  %v395_v47 = vsel %vm379_vm13, 4, %v363_v35  ;;  %vm380_vm14 = vcmp.lt.s32.totalorder %v364_v41, 0  ;;  %vm381_vm15 = vcmp.lt.s32.totalorder %v365_v43, 0  ;;  %1536 = vmatpush3.msra.mxu1 %v705_v44  ;;  %v885_v12 = vld [vmem:[%s2148_s5 + $0x20] sm:$0xff]  ;;  %v884_v13 = vld [vmem:[%s2148_s5 + $0x18] sm:$0xff] }
  0x2c   : > { %1503 = vmatprep.mubr.msk.f32.mxu0 %vm416_vm1, %v403_v21  ;;  %v410_v50 = vcvt.s32.f32 %v394_v46  ;;  %v411_v52 = vcvt.s32.f32 %v395_v47  ;;  %v396_v53 = vsel %vm380_vm14, 4, %v364_v41  ;;  %1537 = vmatprep.subr.mxu1 %v704_v48  ;;  %v397_v54 = vsel %vm381_vm15, 4, %v365_v43  ;;  %v1999_v14 = vld [vmem:[%s2145_s2] ss:$0 sm:$0xff]  ;;  %v882_v1 = vld [vmem:[%s2148_s5 + $0x8] sm:$0xff] }
  0x2d   : > { %vm382_vm0 = vcmp.lt.s32.totalorder %v366_v49, 0  ;;  %1538 = vmatpush3.msra.mxu1 %v704_v48  ;;  %v412_v56 = vcvt.s32.f32 %v396_v53  ;;  %v413_v58 = vcvt.s32.f32 %v397_v54  ;;  %1579 = vmatprep.subr.mxu0 %v895_v2  ;;  %v1784_v27 = vmov 1.0  }
  0x2e   : > { %1539 = vmatprep.subr.mxu1 %v703_v51  ;;  %v398_v59 = vsel %vm382_vm0, 4, %v366_v49  ;;  %1580 = vmatpush3.msra.mxu0 %v895_v2  ;;  %v881_v2 = vld [vmem:[%s2148_s5] sm:$0xff] }
  0x2f   : > { %1504 = vmatmul.mubr.msk.f32.gmra.mxu0 %vm416_vm1, %v404_v26  ;;  %1540 = vmatpush3.msra.mxu1 %v703_v51  ;;  %v414_v60 = vcvt.s32.f32 %v398_v59 }
  0x30   : > { %1506 = vmatprep.mubr.msk.f32.mxu0 %vm416_vm1, %v405_v29  ;;  %1541 = vmatprep.subr.mxu1 %v702_v55 }
  0x31   : > { %1542 = vmatpush3.msra.mxu1 %v702_v55  ;;  %1581 = vmatprep.subr.mxu0 %v894_v3 }
  0x32   : > { %1543 = vmatprep.subr.mxu1 %v701_v57  ;;  %1582 = vmatpush3.msra.mxu0 %v894_v3  ;;  %v1080_v3 = vld [vmem:[#allocation2 + $0x78] sm:$0xff] }
  0x33   : > { %1507 = vmatmul.mubr.msk.f32.gmra.mxu0 %vm416_vm1, %v406_v34  ;;  %1544 = vmatpush3.msra.mxu1 %v701_v57 }
  0x34   : > { %1509 = vmatprep.mubr.msk.f32.mxu0 %vm416_vm1, %v407_v37  ;;  %1545 = vmatprep.subr.mxu1 %v700_v61 }
  0x35   : > { %1546 = vmatpush3.msra.mxu1 %v700_v61  ;;  %1583 = vmatprep.subr.mxu0 %v893_v4 }
  0x36   : > { %1547 = vmatprep.subr.mxu1 %v699_v62  ;;  %1584 = vmatpush3.msra.mxu0 %v893_v4  ;;  %v1079_v4 = vld [vmem:[#allocation2 + $0x70] sm:$0xff] }
  0x37   : > { %1510 = vmatmul.mubr.msk.f32.gmra.mxu0 %vm416_vm1, %v408_v42  ;;  %1548 = vmatpush3.msra.mxu1 %v699_v62 }
  0x38   : > { %1512 = vmatprep.mubr.msk.f32.mxu0 %vm416_vm1, %v409_v45  ;;  %1549 = vmatprep.subr.mxu1 %v698_v63 }
  0x39   : > { %1550 = vmatpush3.msra.mxu1 %v698_v63  ;;  %1585 = vmatprep.subr.mxu0 %v892_v5 }
  0x3a   : > { %1551 = vmatprep.subr.mxu1 %v697_v0  ;;  %1586 = vmatpush3.msra.mxu0 %v892_v5  ;;  %v1078_v5 = vld [vmem:[#allocation2 + $0x68] sm:$0xff] }
  0x3b   : > { %1513 = vmatmul.mubr.msk.f32.gmra.mxu0 %vm416_vm1, %v410_v50  ;;  %1552 = vmatpush3.msra.mxu1 %v697_v0  ;;  %v883_v0 = vld [vmem:[%s2148_s5 + $0x10] sm:$0xff] }
  0x3c   : > { %1515 = vmatprep.mubr.msk.f32.mxu0 %vm416_vm1, %v411_v52  ;;  %1587 = vmatprep.subr.mxu0 %v891_v6 }
  0x3d   : > { %1588 = vmatpush3.msra.mxu0 %v891_v6  ;;  %1689 = vmatprep.subr.mxu1 %v1080_v3  ;;  %v1077_v6 = vld [vmem:[#allocation2 + $0x60] sm:$0xff] }
  0x3e   : > { %1589 = vmatprep.subr.mxu0 %v890_v7 }
  0x3f   : > { %1516 = vmatmul.mubr.msk.f32.gmra.mxu0 %vm416_vm1, %v412_v56 }
  0x40   : > { %1518 = vmatprep.mubr.msk.f32.mxu0 %vm416_vm1, %v413_v58  ;;  %1590 = vmatpush3.msra.mxu0 %v890_v7  ;;  %v2042_v7 = vld [vmem:[#allocation2 + $0x58] sm:$0xff] }
  0x41   : > { %1591 = vmatprep.subr.mxu0 %v889_v8 }
  0x42   : > { %1592 = vmatpush3.msra.mxu0 %v889_v8  ;;  %v2045_v8 = vld [vmem:[#allocation2 + $0x50] sm:$0xff] }
  0x43   : > { %1519 = vmatmul.mubr.msk.f32.gmra.mxu0 %vm416_vm1, %v414_v60  ;;  %1593 = vmatprep.subr.mxu0 %v888_v9 }
  0x44   : > { %1594 = vmatpush3.msra.mxu0 %v888_v9  ;;  %v2049_v9 = vld [vmem:[#allocation2 + $0x48] sm:$0xff] }
  0x45   : > { %1595 = vmatprep.subr.mxu0 %v887_v10 }
  0x46   : > { %1596 = vmatpush3.msra.mxu0 %v887_v10  ;;  %v2053_v10 = vld [vmem:[#allocation2 + $0x40] sm:$0xff] }
  0x47   : > { %1597 = vmatprep.subr.mxu0 %v886_v11 }
  0x48   : > { %1598 = vmatpush3.msra.mxu0 %v886_v11  ;;  %v2057_v11 = vld [vmem:[#allocation2 + $0x38] sm:$0xff] }
  0x49   : > { %1599 = vmatprep.subr.mxu0 %v885_v12 }
  0x4a   : > { %1600 = vmatpush3.msra.mxu0 %v885_v12  ;;  %v2061_v12 = vld [vmem:[#allocation2 + $0x30] sm:$0xff] }
  0x4b   : > { %1601 = vmatprep.subr.mxu0 %v884_v13 }
  0x4c   : > { %1602 = vmatpush3.msra.mxu0 %v884_v13  ;;  %v2065_v13 = vld [vmem:[#allocation2 + $0x28] sm:$0xff] }
  0x4d   : > { %1603 = vmatprep.subr.mxu0 %v883_v0 }
  0x4e   : > { %1604 = vmatpush3.msra.mxu0 %v883_v0  ;;  %v1068_v0 = vld [vmem:[#allocation2 + $0x18] sm:$0xff] }
  0x4f   : > { %1605 = vmatprep.subr.mxu0 %v882_v1 }
  0x50   : > { %1606 = vmatpush3.msra.mxu0 %v882_v1  ;;  %v1067_v1 = vld [vmem:[#allocation2 + $0x10] sm:$0xff] }
  0x51   : > { %1607 = vmatprep.subr.mxu0 %v881_v2 }
  0x52   : > { %1608 = vmatpush3.msra.mxu0 %v881_v2  ;;  %v1066_v2 = vld [vmem:[#allocation2 + $0x8] sm:$0xff] }
  0x53   : > { %1633 = vmatprep.subr.mxu0 %v1080_v3 }
  0xe7   : > { %v1499_v15 = vpop.f32.mrf.mxu0 }
  0xe8   : > { %v618_v16 = vsub.f32 %v1499_v15, %v1999_v14  ;;  %v2077_v15 = vld [vmem:[%s2147_s4] ss:$0 sm:$0xff] }
  0xe9   : > { %v531_v17 = vpop.f32.mrf.mxu0 }
  0xea   : > { %v617_v18 = vsub.f32 %v531_v17, %v1999_v14  ;;  %v634_v19 = vand.u32 2147483647, %v618_v16 }
  0xeb   : > { %v1502_v20 = vpop.f32.mrf.mxu0 }
  0xec   : > { %v620_v21 = vsub.f32 %v1502_v20, %v1999_v14  ;;  %v633_v22 = vand.u32 2147483647, %v617_v18  ;;  %vm650_vm2 = vcmp.lt.f32.partialorder %v634_v19, 0.5 }
  0xed   : > { %v541_v23 = vpop.f32.mrf.mxu0 }
  0xee   : > { %v619_v24 = vsub.f32 %v541_v23, %v1999_v14  ;;  %vm649_vm1 = vcmp.lt.f32.partialorder %v633_v22, 0.5  ;;  %v636_v25 = vand.u32 2147483647, %v620_v21 }
  0xef   : > { %v1505_v26 = vpop.f32.mrf.mxu0  ;;  %1553 = vmatprep.mubr.msk.f32.mxu1 %vm649_vm1, %v1784_v27 }
  0xf0   : > { %v635_v28 = vand.u32 2147483647, %v619_v24  ;;  %v622_v29 = vsub.f32 %v1505_v26, %v1999_v14  ;;  %1554 = vmatmul.mubr.msk.f32.vlgmr.msra.gmra.mxu1 %vm650_vm2, %v1784_v27  ;;  %vm652_vm4 = vcmp.lt.f32.partialorder %v636_v25, 0.5 }
  0xf1   : > { %v551_v30 = vpop.f32.mrf.mxu0  ;;  %1705 = vmatpush3.msra.mxu1 %v1080_v3 }
  0xf2   : > { %vm651_vm3 = vcmp.lt.f32.partialorder %v635_v28, 0.5  ;;  %v621_v31 = vsub.f32 %v551_v30, %v1999_v14  ;;  %v638_v32 = vand.u32 2147483647, %v622_v29  ;;  %1690 = vmatprep.subr.mxu1 %v1079_v4 }
  0xf3   : > { %v1508_v33 = vpop.f32.mrf.mxu0  ;;  %1556 = vmatprep.mubr.msk.f32.mxu1 %vm651_vm3, %v1784_v27  ;;  %1706 = vmatpush3.msra.mxu1 %v1079_v4 }
  0xf4   : > { %v637_v34 = vand.u32 2147483647, %v621_v31  ;;  %v624_v35 = vsub.f32 %v1508_v33, %v1999_v14  ;;  %1557 = vmatmul.mubr.msk.f32.gmra.mxu1 %vm652_vm4, %v1784_v27  ;;  %vm654_vm6 = vcmp.lt.f32.partialorder %v638_v32, 0.5  ;;  %1691 = vmatprep.subr.mxu1 %v1078_v5 }
  0xf5   : > { %v561_v36 = vpop.f32.mrf.mxu0  ;;  %1707 = vmatpush3.msra.mxu1 %v1078_v5 }
  0xf6   : > { %vm653_vm5 = vcmp.lt.f32.partialorder %v637_v34, 0.5  ;;  %v623_v37 = vsub.f32 %v561_v36, %v1999_v14  ;;  %v640_v38 = vand.u32 2147483647, %v624_v35  ;;  %1692 = vmatprep.subr.mxu1 %v1077_v6 }
  0xf7   : > { %v1511_v39 = vpop.f32.mrf.mxu0  ;;  %1559 = vmatprep.mubr.msk.f32.mxu1 %vm653_vm5, %v1784_v27  ;;  %1708 = vmatpush3.msra.mxu1 %v1077_v6 }
  0xf8   : > { %v639_v40 = vand.u32 2147483647, %v623_v37  ;;  %v626_v41 = vsub.f32 %v1511_v39, %v1999_v14  ;;  %1560 = vmatmul.mubr.msk.f32.gmra.mxu1 %vm654_vm6, %v1784_v27  ;;  %vm656_vm8 = vcmp.lt.f32.partialorder %v640_v38, 0.5  ;;  %1693 = vmatprep.subr.mxu1 %v2042_v7 }
  0xf9   : > { %v571_v42 = vpop.f32.mrf.mxu0  ;;  %1709 = vmatpush3.msra.mxu1 %v2042_v7 }
  0xfa   : > { %vm655_vm7 = vcmp.lt.f32.partialorder %v639_v40, 0.5  ;;  %v625_v43 = vsub.f32 %v571_v42, %v1999_v14  ;;  %v642_v44 = vand.u32 2147483647, %v626_v41  ;;  %1694 = vmatprep.subr.mxu1 %v2045_v8 }
  0xfb   : > { %v1514_v45 = vpop.f32.mrf.mxu0  ;;  %1562 = vmatprep.mubr.msk.f32.mxu1 %vm655_vm7, %v1784_v27  ;;  %1710 = vmatpush3.msra.mxu1 %v2045_v8 }
  0xfc   : > { %v641_v46 = vand.u32 2147483647, %v625_v43  ;;  %v628_v47 = vsub.f32 %v1514_v45, %v1999_v14  ;;  %1563 = vmatmul.mubr.msk.f32.gmra.mxu1 %vm656_vm8, %v1784_v27  ;;  %vm658_vm10 = vcmp.lt.f32.partialorder %v642_v44, 0.5  ;;  %1695 = vmatprep.subr.mxu1 %v2049_v9 }
  0xfd   : > { %v581_v48 = vpop.f32.mrf.mxu0  ;;  %1711 = vmatpush3.msra.mxu1 %v2049_v9 }
  0xfe   : > { %vm657_vm9 = vcmp.lt.f32.partialorder %v641_v46, 0.5  ;;  %v627_v49 = vsub.f32 %v581_v48, %v1999_v14  ;;  %v644_v50 = vand.u32 2147483647, %v628_v47  ;;  %1696 = vmatprep.subr.mxu1 %v2053_v10 }
  0xff   : > { %v1517_v51 = vpop.f32.mrf.mxu0  ;;  %1565 = vmatprep.mubr.msk.f32.mxu1 %vm657_vm9, %v1784_v27  ;;  %1712 = vmatpush3.msra.mxu1 %v2053_v10 }
 0x100   : > { %v643_v52 = vand.u32 2147483647, %v627_v49  ;;  %v630_v53 = vsub.f32 %v1517_v51, %v1999_v14  ;;  %1566 = vmatmul.mubr.msk.f32.gmra.mxu1 %vm658_vm10, %v1784_v27  ;;  %vm660_vm12 = vcmp.lt.f32.partialorder %v644_v50, 0.5  ;;  %1697 = vmatprep.subr.mxu1 %v2057_v11 }
 0x101   : > { %v591_v54 = vpop.f32.mrf.mxu0  ;;  %1713 = vmatpush3.msra.mxu1 %v2057_v11 }
 0x102   : > { %vm659_vm11 = vcmp.lt.f32.partialorder %v643_v52, 0.5  ;;  %v629_v55 = vsub.f32 %v591_v54, %v1999_v14  ;;  %v646_v56 = vand.u32 2147483647, %v630_v53  ;;  %1698 = vmatprep.subr.mxu1 %v2061_v12 }
 0x103   : > { %v1520_v57 = vpop.f32.mrf.mxu0  ;;  %1568 = vmatprep.mubr.msk.f32.mxu1 %vm659_vm11, %v1784_v27  ;;  %1714 = vmatpush3.msra.mxu1 %v2061_v12 }
 0x104   : > { %v645_v58 = vand.u32 2147483647, %v629_v55  ;;  %v632_v59 = vsub.f32 %v1520_v57, %v1999_v14  ;;  %1569 = vmatmul.mubr.msk.f32.gmra.mxu1 %vm660_vm12, %v1784_v27  ;;  %vm662_vm14 = vcmp.lt.f32.partialorder %v646_v56, 0.5  ;;  %1699 = vmatprep.subr.mxu1 %v2065_v13 }
 0x105   : > { %v601_v60 = vpop.f32.mrf.mxu0  ;;  %1715 = vmatpush3.msra.mxu1 %v2065_v13 }
 0x106   : > { %vm661_vm13 = vcmp.lt.f32.partialorder %v645_v58, 0.5  ;;  %v631_v61 = vsub.f32 %v601_v60, %v1999_v14  ;;  %v648_v62 = vand.u32 2147483647, %v632_v59  ;;  %v2069_v14 = vld [vmem:[#allocation2 + $0x20] sm:$0xff] }
 0x107   : > { %1571 = vmatprep.mubr.msk.f32.mxu1 %vm661_vm13, %v1784_v27  ;;  %1700 = vmatprep.subr.mxu1 %v2069_v14 }
 0x108   : > { %v647_v63 = vand.u32 2147483647, %v631_v61  ;;  %1572 = vmatmul.mubr.msk.f32.gmra.mxu1 %vm662_vm14, %v1784_v27  ;;  %vm664_vm0 = vcmp.lt.f32.partialorder %v648_v62, 0.5 }
 0x109   : > { %1716 = vmatpush3.msra.mxu1 %v2069_v14 }
 0x10a   : > { %vm663_vm15 = vcmp.lt.f32.partialorder %v647_v63, 0.5  ;;  %1701 = vmatprep.subr.mxu1 %v1068_v0 }
 0x10b   : > { %1574 = vmatprep.mubr.msk.f32.mxu1 %vm663_vm15, %v1784_v27  ;;  %1717 = vmatpush3.msra.mxu1 %v1068_v0 }
 0x10c   : > { %1575 = vmatmul.mubr.msk.f32.gmra.mxu1 %vm664_vm0, %v1784_v27  ;;  %1702 = vmatprep.subr.mxu1 %v1067_v1 }
 0x10d   : > { %1718 = vmatpush3.msra.mxu1 %v1067_v1 }
 0x10e   : > { %1703 = vmatprep.subr.mxu1 %v1066_v2 }
 0x10f   : > { %1719 = vmatpush3.msra.mxu1 %v1066_v2 }
 0x1b0   : > { %v1555_v16 = vpop.f32.mrf.mxu1 }
 0x1b1   : > { %v792_v17 = vadd.f32 %v1555_v16, %v2077_v15 }
 0x1b2   : > { %v786_v18 = vpop.f32.mrf.mxu1 }
 0x1b3   : > { %v787_v19 = vadd.f32 %v2077_v15, %v786_v18  ;;  %v866_v22 = vmax.f32 %v792_v17, 0.0 }
 0x1b4   : > { %v1558_v20 = vpop.f32.mrf.mxu1 }
 0x1b5   : > { %v865_v21 = vmax.f32 %v787_v19, 0.0  ;;  %v802_v23 = vadd.f32 %v1558_v20, %v2077_v15 }
 0x1b6   : > { %v796_v24 = vpop.f32.mrf.mxu1 }
 0x1b7   : > { %v797_v25 = vadd.f32 %v2077_v15, %v796_v24  ;;  %1609 = vmatprep.mubr.f32.mxu0 %v865_v21  ;;  %v868_v28 = vmax.f32 %v802_v23, 0.0 }
 0x1b8   : > { %v1561_v26 = vpop.f32.mrf.mxu1  ;;  %1610 = vmatmul.mubr.f32.vlgmr.msra.gmra.mxu0 %v866_v22 }
 0x1b9   : > { %v867_v27 = vmax.f32 %v797_v25, 0.0  ;;  %1634 = vmatpush3.msra.mxu0 %v1080_v3  ;;  %v812_v29 = vadd.f32 %v1561_v26, %v2077_v15  ;;  %v1065_v3 = vld [vmem:[#allocation2] sm:$0xff] }
 0x1ba   : > { %v806_v30 = vpop.f32.mrf.mxu1  ;;  %1635 = vmatprep.subr.mxu0 %v1079_v4  ;;  %1704 = vmatprep.subr.mxu1 %v1065_v3 }
 0x1bb   : > { %v807_v31 = vadd.f32 %v2077_v15, %v806_v30  ;;  %1612 = vmatprep.mubr.f32.mxu0 %v867_v27  ;;  %1636 = vmatpush3.msra.mxu0 %v1079_v4  ;;  %v870_v34 = vmax.f32 %v812_v29, 0.0  ;;  %v1378_v4 = vld [vmem:[%s2149_s6] ss:$0 sm:$0xff] }
 0x1bc   : > { %v1564_v32 = vpop.f32.mrf.mxu1  ;;  %1613 = vmatmul.mubr.f32.gmra.mxu0 %v868_v28  ;;  %1637 = vmatprep.subr.mxu0 %v1078_v5 }
 0x1bd   : > { %v869_v33 = vmax.f32 %v807_v31, 0.0  ;;  %1638 = vmatpush3.msra.mxu0 %v1078_v5  ;;  %v822_v35 = vadd.f32 %v1564_v32, %v2077_v15  ;;  %1720 = vmatpush3.msra.mxu1 %v1065_v3 }
 0x1be   : > { %v816_v36 = vpop.f32.mrf.mxu1  ;;  %1639 = vmatprep.subr.mxu0 %v1077_v6 }
 0x1bf   : > { %v817_v37 = vadd.f32 %v2077_v15, %v816_v36  ;;  %1615 = vmatprep.mubr.f32.mxu0 %v869_v33  ;;  %1640 = vmatpush3.msra.mxu0 %v1077_v6  ;;  %v872_v40 = vmax.f32 %v822_v35, 0.0 }
 0x1c0   : > { %v1567_v38 = vpop.f32.mrf.mxu1  ;;  %1616 = vmatmul.mubr.f32.gmra.mxu0 %v870_v34  ;;  %1641 = vmatprep.subr.mxu0 %v2042_v7 }
 0x1c1   : > { %v871_v39 = vmax.f32 %v817_v37, 0.0  ;;  %1642 = vmatpush3.msra.mxu0 %v2042_v7  ;;  %v832_v41 = vadd.f32 %v1567_v38, %v2077_v15 }
 0x1c2   : > { %v826_v42 = vpop.f32.mrf.mxu1  ;;  %1643 = vmatprep.subr.mxu0 %v2045_v8 }
 0x1c3   : > { %v827_v43 = vadd.f32 %v2077_v15, %v826_v42  ;;  %1618 = vmatprep.mubr.f32.mxu0 %v871_v39  ;;  %1644 = vmatpush3.msra.mxu0 %v2045_v8  ;;  %v874_v46 = vmax.f32 %v832_v41, 0.0 }
 0x1c4   : > { %v1570_v44 = vpop.f32.mrf.mxu1  ;;  %1619 = vmatmul.mubr.f32.gmra.mxu0 %v872_v40  ;;  %1645 = vmatprep.subr.mxu0 %v2049_v9 }
 0x1c5   : > { %v873_v45 = vmax.f32 %v827_v43, 0.0  ;;  %1646 = vmatpush3.msra.mxu0 %v2049_v9  ;;  %v842_v47 = vadd.f32 %v1570_v44, %v2077_v15 }
 0x1c6   : > { %v836_v48 = vpop.f32.mrf.mxu1  ;;  %1647 = vmatprep.subr.mxu0 %v2053_v10 }
 0x1c7   : > { %v837_v49 = vadd.f32 %v2077_v15, %v836_v48  ;;  %1621 = vmatprep.mubr.f32.mxu0 %v873_v45  ;;  %1648 = vmatpush3.msra.mxu0 %v2053_v10  ;;  %v876_v52 = vmax.f32 %v842_v47, 0.0 }
 0x1c8   : > { %v1573_v50 = vpop.f32.mrf.mxu1  ;;  %1622 = vmatmul.mubr.f32.gmra.mxu0 %v874_v46  ;;  %1649 = vmatprep.subr.mxu0 %v2057_v11 }
 0x1c9   : > { %v875_v51 = vmax.f32 %v837_v49, 0.0  ;;  %1650 = vmatpush3.msra.mxu0 %v2057_v11  ;;  %v852_v53 = vadd.f32 %v1573_v50, %v2077_v15 }
 0x1ca   : > { %v846_v54 = vpop.f32.mrf.mxu1  ;;  %1651 = vmatprep.subr.mxu0 %v2061_v12 }
 0x1cb   : > { %v847_v55 = vadd.f32 %v2077_v15, %v846_v54  ;;  %1624 = vmatprep.mubr.f32.mxu0 %v875_v51  ;;  %1652 = vmatpush3.msra.mxu0 %v2061_v12  ;;  %v878_v58 = vmax.f32 %v852_v53, 0.0  ;;  %v1379_v53 = vld [vmem:[%s2151_s8] ss:$0 sm:$0xff] }
 0x1cc   : > { %v1576_v56 = vpop.f32.mrf.mxu1  ;;  %1625 = vmatmul.mubr.f32.gmra.mxu0 %v876_v52  ;;  %1653 = vmatprep.subr.mxu0 %v2065_v13 }
 0x1cd   : > { %v877_v57 = vmax.f32 %v847_v55, 0.0  ;;  %1654 = vmatpush3.msra.mxu0 %v2065_v13  ;;  %v862_v59 = vadd.f32 %v1576_v56, %v2077_v15 }
 0x1ce   : > { %v856_v60 = vpop.f32.mrf.mxu1  ;;  %1655 = vmatprep.subr.mxu0 %v2069_v14 }
 0x1cf   : > { %v857_v61 = vadd.f32 %v2077_v15, %v856_v60  ;;  %1627 = vmatprep.mubr.f32.mxu0 %v877_v57  ;;  %1656 = vmatpush3.msra.mxu0 %v2069_v14  ;;  %v880_v63 = vmax.f32 %v862_v59, 0.0 }
 0x1d0   : > { %1628 = vmatmul.mubr.f32.gmra.mxu0 %v878_v58  ;;  %1657 = vmatprep.subr.mxu0 %v1068_v0 }
 0x1d1   : > { %v879_v62 = vmax.f32 %v857_v61, 0.0  ;;  %1658 = vmatpush3.msra.mxu0 %v1068_v0 }
 0x1d2   : > { %1659 = vmatprep.subr.mxu0 %v1067_v1 }
 0x1d3   : > { %1630 = vmatprep.mubr.f32.mxu0 %v879_v62  ;;  %1660 = vmatpush3.msra.mxu0 %v1067_v1 }
 0x1d4   : > { %1631 = vmatmul.mubr.f32.gmra.mxu0 %v880_v63  ;;  %1661 = vmatprep.subr.mxu0 %v1066_v2 }
 0x1d5   : > { %1662 = vmatpush3.msra.mxu0 %v1066_v2 }
 0x1d6   : > { %1663 = vmatprep.subr.mxu0 %v1065_v3 }
 0x1d7   : > { %1664 = vmatpush3.msra.mxu0 %v1065_v3 }
 0x278   : > { %v1611_v5 = vpop.f32.mrf.mxu0 }
 0x279   : > { %v976_v6 = vadd.f32 %v1611_v5, %v1378_v4 }
 0x27a   : > { %v970_v7 = vpop.f32.mrf.mxu0 }
 0x27b   : > { %v971_v8 = vadd.f32 %v1378_v4, %v970_v7  ;;  %v1050_v11 = vmax.f32 %v976_v6, 0.0 }
 0x27c   : > { %v1614_v9 = vpop.f32.mrf.mxu0 }
 0x27d   : > { %v1049_v10 = vmax.f32 %v971_v8, 0.0  ;;  %v986_v12 = vadd.f32 %v1614_v9, %v1378_v4 }
 0x27e   : > { %v980_v13 = vpop.f32.mrf.mxu0 }
 0x27f   : > { %v981_v14 = vadd.f32 %v1378_v4, %v980_v13  ;;  %1665 = vmatprep.mubr.f32.mxu0 %v1049_v10  ;;  %v1052_v17 = vmax.f32 %v986_v12, 0.0 }
 0x280   : > { %v1617_v15 = vpop.f32.mrf.mxu0  ;;  %1666 = vmatmul.mubr.f32.vlgmr.msra.gmra.mxu0 %v1050_v11 }
 0x281   : > { %v1051_v16 = vmax.f32 %v981_v14, 0.0  ;;  %v996_v18 = vadd.f32 %v1617_v15, %v1378_v4 }
 0x282   : > { %v990_v19 = vpop.f32.mrf.mxu0 }
 0x283   : > { %v991_v20 = vadd.f32 %v1378_v4, %v990_v19  ;;  %1668 = vmatprep.mubr.f32.mxu0 %v1051_v16  ;;  %v1054_v23 = vmax.f32 %v996_v18, 0.0 }
 0x284   : > { %v1620_v21 = vpop.f32.mrf.mxu0  ;;  %1669 = vmatmul.mubr.f32.gmra.mxu0 %v1052_v17 }
 0x285   : > { %v1053_v22 = vmax.f32 %v991_v20, 0.0  ;;  %v1006_v24 = vadd.f32 %v1620_v21, %v1378_v4 }
 0x286   : > { %v1000_v25 = vpop.f32.mrf.mxu0 }
 0x287   : > { %v1001_v26 = vadd.f32 %v1378_v4, %v1000_v25  ;;  %1671 = vmatprep.mubr.f32.mxu0 %v1053_v22  ;;  %v1056_v29 = vmax.f32 %v1006_v24, 0.0 }
 0x288   : > { %v1623_v27 = vpop.f32.mrf.mxu0  ;;  %1672 = vmatmul.mubr.f32.gmra.mxu0 %v1054_v23 }
 0x289   : > { %v1055_v28 = vmax.f32 %v1001_v26, 0.0  ;;  %v1016_v30 = vadd.f32 %v1623_v27, %v1378_v4 }
 0x28a   : > { %v1010_v31 = vpop.f32.mrf.mxu0 }
 0x28b   : > { %v1011_v32 = vadd.f32 %v1378_v4, %v1010_v31  ;;  %1674 = vmatprep.mubr.f32.mxu1 %v1055_v28  ;;  %v1058_v35 = vmax.f32 %v1016_v30, 0.0 }
 0x28c   : > { %v1626_v33 = vpop.f32.mrf.mxu0  ;;  %1675 = vmatmul.mubr.f32.vlgmr.msra.gmra.mxu1 %v1056_v29 }
 0x28d   : > { %v1057_v34 = vmax.f32 %v1011_v32, 0.0  ;;  %v1026_v36 = vadd.f32 %v1626_v33, %v1378_v4 }
 0x28e   : > { %v1020_v37 = vpop.f32.mrf.mxu0 }
 0x28f   : > { %v1021_v38 = vadd.f32 %v1378_v4, %v1020_v37  ;;  %1677 = vmatprep.mubr.f32.mxu1 %v1057_v34  ;;  %v1060_v41 = vmax.f32 %v1026_v36, 0.0 }
 0x290   : > { %v1629_v39 = vpop.f32.mrf.mxu0  ;;  %1678 = vmatmul.mubr.f32.gmra.mxu1 %v1058_v35 }
 0x291   : > { %v1059_v40 = vmax.f32 %v1021_v38, 0.0  ;;  %v1036_v42 = vadd.f32 %v1629_v39, %v1378_v4 }
 0x292   : > { %v1030_v43 = vpop.f32.mrf.mxu0 }
 0x293   : > { %v1031_v44 = vadd.f32 %v1378_v4, %v1030_v43  ;;  %1680 = vmatprep.mubr.f32.mxu1 %v1059_v40  ;;  %v1062_v47 = vmax.f32 %v1036_v42, 0.0 }
 0x294   : > { %v1632_v45 = vpop.f32.mrf.mxu0  ;;  %1681 = vmatmul.mubr.f32.gmra.mxu1 %v1060_v41 }
 0x295   : > { %v1061_v46 = vmax.f32 %v1031_v44, 0.0  ;;  %v1046_v48 = vadd.f32 %v1632_v45, %v1378_v4 }
 0x296   : > { %v1040_v49 = vpop.f32.mrf.mxu0 }
 0x297   : > { %v1041_v50 = vadd.f32 %v1378_v4, %v1040_v49  ;;  %1683 = vmatprep.mubr.f32.mxu1 %v1061_v46  ;;  %v1064_v52 = vmax.f32 %v1046_v48, 0.0 }
 0x298   : > { %1684 = vmatmul.mubr.f32.gmra.mxu1 %v1062_v47 }
 0x299   : > { %v1063_v51 = vmax.f32 %v1041_v50, 0.0 }
 0x29b   : > { %1686 = vmatprep.mubr.f32.mxu1 %v1063_v51 }
 0x29c   : > { %1687 = vmatmul.mubr.f32.gmra.mxu1 %v1064_v52 }
 0x340   : > { %v1667_v54 = vpop.f32.mrf.mxu0 }
 0x341   : > { %v1160_v55 = vadd.f32 %v1667_v54, %v1379_v53 }
 0x342   : > { %v1154_v56 = vpop.f32.mrf.mxu0 }
 0x343   : > { %1234 = vst [vmem:[%s2122_s10 + $0x8] sm:$0xff] %v1160_v55  ;;  %v1155_v57 = vadd.f32 %v1379_v53, %v1154_v56 }
 0x344   : > { %v1670_v58 = vpop.f32.mrf.mxu0 }
 0x345   : > { %1233 = vst [vmem:[%s2122_s10] sm:$0xff] %v1155_v57  ;;  %v1170_v59 = vadd.f32 %v1670_v58, %v1379_v53 }
 0x346   : > { %v1164_v60 = vpop.f32.mrf.mxu0 }
 0x347   : > { %1236 = vst [vmem:[%s2122_s10 + $0x18] sm:$0xff] %v1170_v59  ;;  %v1165_v61 = vadd.f32 %v1379_v53, %v1164_v60 }
 0x348   : > { %v1673_v62 = vpop.f32.mrf.mxu0 }
 0x349   : > { %1235 = vst [vmem:[%s2122_s10 + $0x10] sm:$0xff] %v1165_v61  ;;  %v1180_v63 = vadd.f32 %v1673_v62, %v1379_v53 }
 0x34a   : > { %v1174_v0 = vpop.f32.mrf.mxu0 }
 0x34b   : > { %1238 = vst [vmem:[%s2122_s10 + $0x28] sm:$0xff] %v1180_v63  ;;  %v1175_v1 = vadd.f32 %v1379_v53, %v1174_v0 }
 0x34c   : > { %v1676_v2 = vpop.f32.mrf.mxu1 }
 0x34d   : > { %1237 = vst [vmem:[%s2122_s10 + $0x20] sm:$0xff] %v1175_v1  ;;  %v1190_v3 = vadd.f32 %v1676_v2, %v1379_v53 }
 0x34e   : > { %v1184_v4 = vpop.f32.mrf.mxu1 }
 0x34f   : > { %1240 = vst [vmem:[%s2122_s10 + $0x38] sm:$0xff] %v1190_v3  ;;  %v1185_v5 = vadd.f32 %v1379_v53, %v1184_v4 }
 0x350   : > { %v1679_v6 = vpop.f32.mrf.mxu1 }
 0x351   : > { %1239 = vst [vmem:[%s2122_s10 + $0x30] sm:$0xff] %v1185_v5  ;;  %v1200_v7 = vadd.f32 %v1679_v6, %v1379_v53 }
 0x352   : > { %v1194_v8 = vpop.f32.mrf.mxu1 }
 0x353   : > { %1242 = vst [vmem:[%s2122_s10 + $0x48] sm:$0xff] %v1200_v7  ;;  %v1195_v9 = vadd.f32 %v1379_v53, %v1194_v8 }
 0x354   : > { %v1682_v10 = vpop.f32.mrf.mxu1 }
 0x355   : > { %1241 = vst [vmem:[%s2122_s10 + $0x40] sm:$0xff] %v1195_v9  ;;  %v1210_v11 = vadd.f32 %v1682_v10, %v1379_v53 }
 0x356   : > { %v1204_v12 = vpop.f32.mrf.mxu1 }
 0x357   : > { %1244 = vst [vmem:[%s2122_s10 + $0x58] sm:$0xff] %v1210_v11  ;;  %v1205_v13 = vadd.f32 %v1379_v53, %v1204_v12 }
 0x358   : > { %v1685_v14 = vpop.f32.mrf.mxu1 }
 0x359   : > { %1243 = vst [vmem:[%s2122_s10 + $0x50] sm:$0xff] %v1205_v13  ;;  %v1220_v15 = vadd.f32 %v1685_v14, %v1379_v53 }
 0x35a   : > { %v1214_v16 = vpop.f32.mrf.mxu1 }
 0x35b   : > { %1246 = vst [vmem:[%s2122_s10 + $0x68] sm:$0xff] %v1220_v15  ;;  %v1215_v17 = vadd.f32 %v1379_v53, %v1214_v16 }
 0x35c   : > { %v1688_v18 = vpop.f32.mrf.mxu1 }
 0x35d   : > { %1245 = vst [vmem:[%s2122_s10 + $0x60] sm:$0xff] %v1215_v17  ;;  %v1230_v19 = vadd.f32 %v1688_v18, %v1379_v53 }
 0x35e   : > { %v1224_v20 = vpop.f32.mrf.mxu1 }
 0x35f   : > { %1248 = vst [vmem:[%s2122_s10 + $0x78] sm:$0xff] %v1230_v19  ;;  %v1225_v21 = vadd.f32 %v1379_v53, %v1224_v20 }
 0x361   : > { %1247 = vst [vmem:[%s2122_s10 + $0x70] sm:$0xff] %v1225_v21 }
 0x362 PF: > { %s20_s30 = sadd.s32 1, %s1779_s30  }
 0x363   : > { %p17_p1 = scmp.ge.s32.totalorder %s20_s30, 4  }
 0x365   :  { %19 = sbr.rel (!%p17_p1) target bundleno = 1 (0x1), region = 91 }
 0x36a   :  { %1271 = vsyncpa [#allocation3], 1 }
 0x36b   :  { %1273 = vsyncpa [#allocation3 + $0x1], 1 }

</bundles_post_ra>
